<compile_context>
chip_gen: v6e
topology: v6e:2x2x1
jax: 0.10.0
libtpu: 0.0.40
codegen_flags: <defaults>
</compile_context>

<pallas_src>
import jax
import jax.numpy as jnp
from jax.experimental import pallas as pl
from jax.experimental.pallas import tpu as pltpu

# Feature dims of the canonical Sequential(Linear, ReLU, Linear).
D_IN = 128
D_HID = 256
D_OUT = 128

MAX_TILE_M = 2048   # amortize per-step overhead (mem-bound regime)
MIN_TILE_M = 256    # clean multiple of 8 sublanes / MXU tiles


def mlp_kernel(x_ref, w1_ref, b1_ref, w2_ref, b2_ref, o_ref):
    """Fused Linear -> ReLU -> Linear on one (tile_m, D_IN) batch tile."""
    # In-kernel f32 -> bf16 cast (free VPU work; halves x-side HBM traffic
    # compared to a wrapper-side cast pass).
    x = x_ref[...].astype(jnp.bfloat16)                       # (tile_m, D_IN)
    # Linear 1: bf16 x bf16 -> f32 accumulator on the MXU.
    h = jnp.dot(x, w1_ref[...], preferred_element_type=jnp.float32)
    h = h + b1_ref[...]                                       # f32 bias (1, D_HID)
    # ReLU on the f32 accumulator (VPU slots, hidden under MXU drain).
    h = jnp.maximum(h, 0.0)
    # Linear 2: cast activations to bf16 for MXU-native rate, accumulate f32.
    y = jnp.dot(h.astype(w2_ref.dtype), w2_ref[...],
                preferred_element_type=jnp.float32)
    y = y + b2_ref[...]                                       # f32 bias (1, D_OUT)
    o_ref[...] = y.astype(o_ref.dtype)                        # bf16 output


def _pick_tile_m(batch: int) -> int:
    """Largest tile <= MAX_TILE_M, keeping >=2 grid steps when batch allows."""
    if batch <= MIN_TILE_M:
        return MIN_TILE_M
    # Round half the batch up to a multiple of MIN_TILE_M so two TCs on v7x
    # both get a tile; cap at MAX_TILE_M.
    half = (batch + 1) // 2
    half_rounded = ((half + MIN_TILE_M - 1) // MIN_TILE_M) * MIN_TILE_M
    return min(MAX_TILE_M, half_rounded)


@jax.jit
def my_sequential_forward(x, w1, b1, w2, b2):
    """forward(x) = ReLU(x @ w1 + b1) @ w2 + b2, batch-tiled on TPU."""
    B, d_in = x.shape
    d_hid = w1.shape[1]
    d_out = w2.shape[1]

    tile_m = _pick_tile_m(B)
    n_tiles = pl.cdiv(B, tile_m)          # last block may be ragged (OOB masked)

    # Weights to bf16 (tiny, one-off); biases stay f32 and are added on the
    # f32 accumulator inside the kernel. x stays f32 (cast happens in-kernel).
    x_f = x.astype(jnp.float32)
    w1_bf = w1.astype(jnp.bfloat16)
    w2_bf = w2.astype(jnp.bfloat16)
    b1_f = b1.astype(jnp.float32).reshape(1, d_hid)
    b2_f = b2.astype(jnp.float32).reshape(1, d_out)

    flops = 2 * B * (d_in * d_hid + d_hid * d_out)
    bytes_accessed = (
        x_f.size * 4                                   # f32 x read
        + w1_bf.size * 2 + w2_bf.size * 2              # bf16 weights
        + b1_f.size * 4 + b2_f.size * 4                # f32 biases
        + B * d_out * 2                                # bf16 output
    )

    out = pl.pallas_call(
        mlp_kernel,
        out_shape=jax.ShapeDtypeStruct((B, d_out), jnp.bfloat16),
        grid=(n_tiles,),
        in_specs=[
            pl.BlockSpec((tile_m, d_in), lambda i: (i, 0)),   # x: tiled over batch
            pl.BlockSpec((d_in, d_hid), lambda i: (0, 0)),    # w1: VMEM-resident
            pl.BlockSpec((1, d_hid), lambda i: (0, 0)),       # b1: VMEM-resident
            pl.BlockSpec((d_hid, d_out), lambda i: (0, 0)),   # w2: VMEM-resident
            pl.BlockSpec((1, d_out), lambda i: (0, 0)),       # b2: VMEM-resident
        ],
        out_specs=pl.BlockSpec((tile_m, d_out), lambda i: (i, 0)),
        compiler_params=pltpu.CompilerParams(
            dimension_semantics=("parallel",)),               # shard tiles on v7x
        cost_estimate=pl.CostEstimate(
            flops=flops, transcendentals=0, bytes_accessed=bytes_accessed),
    )(x_f, w1_bf, b1_f, w2_bf, b2_f)

    return out


def init_params(key):
    """Deterministic init mimicking nn.Linear's uniform fan-in init."""
    k1, k2, k3, k4 = jax.random.split(key, 4)
    bound1 = 1.0 / (D_IN ** 0.5)
    bound2 = 1.0 / (D_HID ** 0.5)
    w1 = jax.random.uniform(k1, (D_IN, D_HID), jnp.float32, -bound1, bound1)
    b1 = jax.random.uniform(k2, (D_HID,), jnp.float32, -bound1, bound1)
    w2 = jax.random.uniform(k3, (D_HID, D_OUT), jnp.float32, -bound2, bound2)
    b2 = jax.random.uniform(k4, (D_OUT,), jnp.float32, -bound2, bound2)
    return w1, b1, w2, b2


if __name__ == "__main__":
    key = jax.random.PRNGKey(0)
    kx, kp = jax.random.split(key)

    # Batch deliberately not a multiple of the tile so the ragged last block
    # path (masked OOB stores) and the 2-step batch pipeline are exercised.
    BATCH = 300
    x = jax.random.normal(kx, (BATCH, D_IN), jnp.float32)
    w1, b1, w2, b2 = init_params(kp)

    out = my_sequential_forward(x, w1, b1, w2, b2)
    out = jax.block_until_ready(out)
    assert out.shape == (BATCH, D_OUT)
    assert out.dtype == jnp.bfloat16
    assert bool(jnp.all(jnp.isfinite(out.astype(jnp.float32))))

    # Reference in plain JAX mirroring the kernel's numerics
    # (bf16 operands, f32 accumulation / bias / ReLU, bf16 output).
    xb = x.astype(jnp.bfloat16)
    w1b = w1.astype(jnp.bfloat16)
    w2b = w2.astype(jnp.bfloat16)
    h_ref = jnp.dot(xb, w1b, preferred_element_type=jnp.float32) + b1[None, :]
    h_ref = jnp.maximum(h_ref, 0.0)
    ref = jnp.dot(h_ref.astype(jnp.bfloat16), w2b,
                  preferred_element_type=jnp.float32) + b2[None, :]
    ref_bf = ref.astype(jnp.bfloat16).astype(jnp.float32)

    diff = jnp.max(jnp.abs(out.astype(jnp.float32) - ref_bf))
    assert jnp.allclose(out.astype(jnp.float32), ref_bf,
                        atol=2e-2, rtol=2e-2), float(diff)

    print("KERNEL_OK")
</pallas_src>

<mosaic_0001>
module attributes {stable_mosaic.version = 11 : i64} {
  func.func @mlp_kernel(%arg0: i32, %arg1: memref<256x128xf32, #tpu.memory_space<vmem>>, %arg2: memref<128x256xbf16, #tpu.memory_space<vmem>>, %arg3: memref<1x256xf32, #tpu.memory_space<vmem>>, %arg4: memref<256x128xbf16, #tpu.memory_space<vmem>>, %arg5: memref<1x128xf32, #tpu.memory_space<vmem>>, %arg6: memref<256x128xbf16, #tpu.memory_space<vmem>>) attributes {dimension_semantics = [#tpu.dimension_semantics<parallel>], iteration_bounds = array<i64: 2>, scalar_prefetch = 0 : i64, scratch_operands = 0 : i64, tpu.core_type = #tpu.core_type<tc>, window_params = [{transform_indices = @transform_0, window_bounds = array<i64: 256, 128>}, {pipeline_mode = #tpu.pipeline_mode<synchronous>, transform_indices = @transform_1, window_bounds = array<i64: 128, 256>}, {pipeline_mode = #tpu.pipeline_mode<synchronous>, transform_indices = @transform_2, window_bounds = array<i64: 1, 256>}, {pipeline_mode = #tpu.pipeline_mode<synchronous>, transform_indices = @transform_3, window_bounds = array<i64: 256, 128>}, {pipeline_mode = #tpu.pipeline_mode<synchronous>, transform_indices = @transform_4, window_bounds = array<i64: 1, 128>}, {transform_indices = @transform_5, window_bounds = array<i64: 256, 128>}]} {
    %c0 = arith.constant 0 : index
    %c0_0 = arith.constant 0 : index
    %0 = vector.load %arg1[%c0, %c0_0] : memref<256x128xf32, #tpu.memory_space<vmem>>, vector<256x128xf32>
    %1 = arith.truncf %0 : vector<256x128xf32> to vector<256x128xbf16>
    %c0_1 = arith.constant 0 : index
    %c0_2 = arith.constant 0 : index
    %2 = vector.load %arg2[%c0_1, %c0_2] : memref<128x256xbf16, #tpu.memory_space<vmem>>, vector<128x256xbf16>
    %cst = arith.constant dense<0.000000e+00> : vector<256x256xf32>
    %3 = tpu.matmul %1, %2, %cst {dimension_numbers = #tpu.dot_dimension_numbers<[1], [0], [0], [1], [0, 0, 1, 1], [], []>} : vector<256x128xbf16>, vector<128x256xbf16>, vector<256x256xf32> -> vector<256x256xf32>
    %c0_3 = arith.constant 0 : index
    %c0_4 = arith.constant 0 : index
    %4 = vector.load %arg3[%c0_3, %c0_4] : memref<1x256xf32, #tpu.memory_space<vmem>>, vector<1x256xf32>
    %5 = vector.broadcast %4 : vector<1x256xf32> to vector<256x256xf32>
    %6 = arith.addf %3, %5 : vector<256x256xf32>
    %cst_5 = arith.constant 0.000000e+00 : f32
    %7 = vector.broadcast %cst_5 : f32 to vector<256x256xf32>
    %8 = arith.maximumf %6, %7 : vector<256x256xf32>
    %9 = arith.truncf %8 : vector<256x256xf32> to vector<256x256xbf16>
    %c0_6 = arith.constant 0 : index
    %c0_7 = arith.constant 0 : index
    %10 = vector.load %arg4[%c0_6, %c0_7] : memref<256x128xbf16, #tpu.memory_space<vmem>>, vector<256x128xbf16>
    %cst_8 = arith.constant dense<0.000000e+00> : vector<256x128xf32>
    %11 = tpu.matmul %9, %10, %cst_8 {dimension_numbers = #tpu.dot_dimension_numbers<[1], [0], [0], [1], [0, 0, 1, 1], [], []>} : vector<256x256xbf16>, vector<256x128xbf16>, vector<256x128xf32> -> vector<256x128xf32>
    %c0_9 = arith.constant 0 : index
    %c0_10 = arith.constant 0 : index
    %12 = vector.load %arg5[%c0_9, %c0_10] : memref<1x128xf32, #tpu.memory_space<vmem>>, vector<1x128xf32>
    %13 = vector.broadcast %12 : vector<1x128xf32> to vector<256x128xf32>
    %14 = arith.addf %11, %13 : vector<256x128xf32>
    %15 = arith.truncf %14 : vector<256x128xf32> to vector<256x128xbf16>
    %c0_11 = arith.constant 0 : index
    %c0_12 = arith.constant 0 : index
    %16 = vector.load %arg6[%c0_11, %c0_12] : memref<256x128xbf16, #tpu.memory_space<vmem>>, vector<256x128xbf16>
    tpu.vector_store %arg6[%c0_11, %c0_12], %15 {strides = array<i32>} : memref<256x128xbf16, #tpu.memory_space<vmem>>, vector<256x128xbf16>,
    return
  }
  func.func @transform_0(%arg0: i32) -> (i32, i32) {
    %c0_i32 = arith.constant 0 : i32
    %c0_i32_0 = arith.constant 0 : i32
    return %arg0, %c0_i32 : i32, i32
  }
  func.func @transform_1(%arg0: i32) -> (i32, i32) {
    %c0_i32 = arith.constant 0 : i32
    %c0_i32_0 = arith.constant 0 : i32
    %c0_i32_1 = arith.constant 0 : i32
    return %c0_i32, %c0_i32_0 : i32, i32
  }
  func.func @transform_2(%arg0: i32) -> (i32, i32) {
    %c0_i32 = arith.constant 0 : i32
    %c0_i32_0 = arith.constant 0 : i32
    %c0_i32_1 = arith.constant 0 : i32
    return %c0_i32, %c0_i32_0 : i32, i32
  }
  func.func @transform_3(%arg0: i32) -> (i32, i32) {
    %c0_i32 = arith.constant 0 : i32
    %c0_i32_0 = arith.constant 0 : i32
    %c0_i32_1 = arith.constant 0 : i32
    return %c0_i32, %c0_i32_0 : i32, i32
  }
  func.func @transform_4(%arg0: i32) -> (i32, i32) {
    %c0_i32 = arith.constant 0 : i32
    %c0_i32_0 = arith.constant 0 : i32
    %c0_i32_1 = arith.constant 0 : i32
    return %c0_i32, %c0_i32_0 : i32, i32
  }
  func.func @transform_5(%arg0: i32) -> (i32, i32) {
    %c0_i32 = arith.constant 0 : i32
    %c0_i32_0 = arith.constant 0 : i32
    return %arg0, %c0_i32 : i32, i32
  }
}

</mosaic_0001>

<bundles_post_ra>
// kernel: my_sequential_forward.1
= control target key start
LH: loop header
LB: loop body
LE: loop exit
PB: predicated region body
PF: predicated region fallthrough
CT: control target
= control target key end

     0   :  { %10 = vsyncpa [#allocation3], 0  ;;  %s2125_s0 = inlined_call_operand.vmem [shape: f32[300,128], index: 0, kind: input, shape index: {}]   ;;  %s2126_s1 = inlined_call_operand.vmem [shape: bf16[128,256], index: 1, kind: input, shape index: {}]   ;;  %s2127_s2 = inlined_call_operand.vmem [shape: f32[1,256], index: 2, kind: input, shape index: {}]   ;;  %s2128_s3 = inlined_call_operand.vmem [shape: bf16[256,128], index: 3, kind: input, shape index: {}]   ;;  %s2129_s4 = inlined_call_operand.vmem [shape: f32[1,128], index: 4, kind: input, shape index: {}]   ;;  %s2130_s5 = inlined_call_operand.hbm [shape: bf16[300,128], index: 5, kind: output, shape index: {}]  }
   0x1   :  { %12 = vsyncpa [#allocation3 + $0x1], 0  ;;  %s1732_s18 = smov 0   ;;  %s1734_s19 = smov 0  }
   0x2   :  { %s1736_s20 = smov 0   ;;  %s1738_s21 = smov 0  }
   0x3 LB: > { %s1753_s22 = sadd.s32 4294967295, %s1696_s21   ;;  %s1234_s23 = sadd.s32 4294967294, %s1696_s21   ;;  %s1696_s21 = sphi %s1738_s21, %s2136_s21   ;;  %s1692_s20 = sphi %s1736_s20, %s2135_s20   ;;  %s1688_s19 = sphi %s1734_s19, %s2134_s19   ;;  %s1684_s18 = sphi %s1732_s18, %s2133_s18  }
   0x4   : > { %s1757_s24 = sadd.s32 1, %s1696_s21   ;;  %s135_s25 = sadd.s32 1, %s1692_s20 }
   0x5   : > { %s132_s26 = ssub.s32 %s1696_s21, %s1757_s24  ;;  %p145_p0 = scmp.ne.s32.totalorder %s1692_s20, %s1688_s19 }
   0x6   : > { %p133_p1 = scmp.eq.s32.totalorder %s132_s26, 0  ;;  %p146_p2 = scmp.eq.s32.totalorder %s1753_s22, 1 }
   0x7   : > { %p151_p3 = scmp.ne.s32.totalorder %s1688_s19, %s1684_s18  ;;  %p152_p4 = scmp.eq.s32.totalorder %s1234_s23, 1 }
   0x8   : > { %s1768_s27 = scalar_select %p133_p1, %s1692_s20, %s135_s25  }
   0x9   : > { %p1770_p5 = por %p146_p2, %p145_p0  ;;  %p1774_p6 = por %p152_p4, %p151_p3 }
   0xa   : > { %p1237_p7 = scmp.ge.s32.totalorder %s1696_s21, 1  ;;  %p199_p8 = scmp.lt.s32.totalorder %s1696_s21, 3 }
   0xc   : > { %p200_p9 = pnand %p1237_p7, %p199_p8 }
   0xd   : > { %s1803_s25 = sshll.u32 (!%p200_p9), %s1753_s22, 5 }
   0xe   : > { %203 = sbr.rel (%p200_p9) target bundleno = 611 (0x263), region = 40  ;;  %p236_p10 = scmp.lt.s32.totalorder (!%p200_p9), %s1803_s25, 37 }
  0x13   : > { %v1596_v0 = vld [vmem:[%s2126_s1 + $0x74] ss:$8 sps:$4 sm:$0xff]   ;;  %v1598_v1 = vld [vmem:[%s2126_s1 + $0x70] ss:$8 sps:$4 sm:$0xff]   ;;  %v1698_v2 = vmov 0   ;;  %s237_s12 = scalar_select %p236_p10, %s1803_s25, 37 }
  0x14   : > { %439 = vmatprep.mubr.bf16.mxu0 %v1698_v2  ;;  %407 = vmatprep.subr.bf16.mxu0 %v1596_v0  ;;  %v1599_v3 = vld [vmem:[%s2126_s1 + $0x64] ss:$8 sps:$4 sm:$0xff]   ;;  %v1601_v4 = vld [vmem:[%s2126_s1 + $0x60] ss:$8 sps:$4 sm:$0xff]   ;;  %v1602_v5 = vld [vmem:[%s2126_s1 + $0x54] ss:$8 sps:$4 sm:$0xff]  }
  0x15   : > { %408 = vmatpush1.bf16.msra.mxu0 %v1598_v1  ;;  %v1604_v6 = vld [vmem:[%s2126_s1 + $0x50] ss:$8 sps:$4 sm:$0xff]   ;;  %v1605_v7 = vld [vmem:[%s2126_s1 + $0x44] ss:$8 sps:$4 sm:$0xff]   ;;  %v1607_v8 = vld [vmem:[%s2126_s1 + $0x40] ss:$8 sps:$4 sm:$0xff]  }
  0x16   : > { %409 = vmatprep.subr.bf16.mxu0 %v1599_v3  ;;  %v1608_v9 = vld [vmem:[%s2126_s1 + $0x34] ss:$8 sps:$4 sm:$0xff]   ;;  %v1610_v10 = vld [vmem:[%s2126_s1 + $0x30] ss:$8 sps:$4 sm:$0xff]   ;;  %v1611_v11 = vld [vmem:[%s2126_s1 + $0x24] ss:$8 sps:$4 sm:$0xff]  }
  0x17   : > { %v1613_v12 = vld [vmem:[%s2126_s1 + $0x20] ss:$8 sps:$4 sm:$0xff]   ;;  %v1614_v13 = vld [vmem:[%s2126_s1 + $0x14] ss:$8 sps:$4 sm:$0xff]   ;;  %s1240_s17 = sshll.u32 %s237_s12, 3  ;;  %s1161_s8 = ssub.s32 (%p1770_p5), 38, %s1803_s25 }
  0x18   : > { %v1616_v14 = vld [vmem:[%s2126_s1 + $0x10] ss:$8 sps:$4 sm:$0xff]   ;;  %v1617_v15 = vld [vmem:[%s2126_s1 + $0x4] ss:$8 sps:$4 sm:$0xff]   ;;  %s1834_s9 = scalar_lea.vmem %s2125_s0, %s1240_s17  ;;  %v1619_v19 = vld [vmem:[%s2126_s1] ss:$8 sps:$4 sm:$0xff]  }
  0x19   : > { %410 = vmatpush1.bf16.msra.mxu0 %v1601_v4  ;;  %v1620_v16 = vld [vmem:[%s2128_s3 + $0x78] sm:$0xff]   ;;  %v1622_v18 = vld [vmem:[%s2128_s3 + $0x70] sm:$0xff]   ;;  %v251_v20 = vld [vmem:[%s1834_s9] sm:$0xff]  ;;  %p1162_p11 = scmp.lt.s32.totalorder (%p1770_p5), %s1161_s8, 32 }
  0x1a   : > { %411 = vmatprep.subr.bf16.mxu0 %v1602_v5  ;;  %v1621_v17 = vld [vmem:[%s2128_s3 + $0x38] sm:$0xff]   ;;  %v252_v21 = vld [vmem:[%s1834_s9 + $0x8] sm:$0xff]  ;;  %1443 = vmatprep.subr.bf16.mxu1 %v1620_v16  ;;  %v1623_v22 = vld [vmem:[%s2128_s3 + $0x30] sm:$0xff]  }
  0x1b   : > { %1444 = vmatpush3.bf16.msra.mxu1 %v1621_v17  ;;  %v283_v23 = vpack.c.bf16 %v252_v21, %v251_v20  ;;  %v1624_v24 = vld [vmem:[%s2128_s3 + $0x68] sm:$0xff]   ;;  %v1626_v26 = vld [vmem:[%s2128_s3 + $0x60] sm:$0xff]   ;;  %v253_v27 = vld [vmem:[%s1834_s9 + $0x10] sm:$0xff] }
  0x1c   : > { %1445 = vmatprep.subr.bf16.mxu1 %v1622_v18  ;;  %v1625_v25 = vld [vmem:[%s2128_s3 + $0x28] sm:$0xff]   ;;  %v254_v28 = vld [vmem:[%s1834_s9 + $0x18] sm:$0xff]  ;;  %v1627_v29 = vld [vmem:[%s2128_s3 + $0x20] sm:$0xff]   ;;  %v317_v18 = vlaneseq }
  0x1d   : > { %412 = vmatpush1.bf16.msra.mxu0 %v1604_v6  ;;  %v284_v30 = vpack.c.bf16 %v254_v28, %v253_v27  ;;  %v1628_v31 = vld [vmem:[%s2128_s3 + $0x58] sm:$0xff]   ;;  %v255_v33 = vld [vmem:[%s1834_s9 + $0x20] sm:$0xff]  ;;  %v256_v34 = vld [vmem:[%s1834_s9 + $0x28] sm:$0xff] }
  0x1e   : > { %413 = vmatprep.subr.bf16.mxu0 %v1605_v7  ;;  %v1629_v32 = vld [vmem:[%s2128_s3 + $0x18] sm:$0xff]   ;;  %v285_v35 = vpack.c.bf16 %v256_v34, %v255_v33  ;;  %v257_v36 = vld [vmem:[%s1834_s9 + $0x30] sm:$0xff]  ;;  %v259_v39 = vld [vmem:[%s1834_s9 + $0x40] sm:$0xff] }
  0x1f   : > { %1446 = vmatpush3.bf16.msra.mxu1 %v1623_v22  ;;  %v258_v37 = vld [vmem:[%s1834_s9 + $0x38] sm:$0xff]  ;;  %v260_v40 = vld [vmem:[%s1834_s9 + $0x48] sm:$0xff]  ;;  %v261_v42 = vld [vmem:[%s1834_s9 + $0x50] sm:$0xff] }
  0x20   : > { %1447 = vmatprep.subr.bf16.mxu1 %v1624_v24  ;;  %v286_v38 = vpack.c.bf16 %v258_v37, %v257_v36  ;;  %v287_v41 = vpack.c.bf16 %v260_v40, %v259_v39  ;;  %v262_v43 = vld [vmem:[%s1834_s9 + $0x58] sm:$0xff]  ;;  %v263_v45 = vld [vmem:[%s1834_s9 + $0x60] sm:$0xff]  ;;  %v264_v46 = vld [vmem:[%s1834_s9 + $0x68] sm:$0xff] }
  0x21   : > { %414 = vmatpush1.bf16.msra.mxu0 %v1607_v8  ;;  %v288_v44 = vpack.c.bf16 %v262_v43, %v261_v42  ;;  %v289_v47 = vpack.c.bf16 %v264_v46, %v263_v45  ;;  %v265_v48 = vld [vmem:[%s1834_s9 + $0x70] sm:$0xff]  ;;  %v266_v49 = vld [vmem:[%s1834_s9 + $0x78] sm:$0xff]  ;;  %v267_v51 = vld [vmem:[%s1834_s9 + $0x80] sm:$0xff] }
  0x22   : > { %415 = vmatprep.subr.bf16.mxu0 %v1608_v9  ;;  %v290_v50 = vpack.c.bf16 %v266_v49, %v265_v48  ;;  %v268_v52 = vld [vmem:[%s1834_s9 + $0x88] sm:$0xff]  ;;  %v1630_v54 = vld [vmem:[%s2128_s3 + $0x50] sm:$0xff]   ;;  %v270_v56 = vld [vmem:[%s1834_s9 + $0x98] sm:$0xff] }
  0x23   : > { %1448 = vmatpush3.bf16.msra.mxu1 %v1625_v25  ;;  %v291_v53 = vpack.c.bf16 %v268_v52, %v267_v51  ;;  %v269_v55 = vld [vmem:[%s1834_s9 + $0x90] sm:$0xff]  ;;  %v1632_v59 = vld [vmem:[%s2128_s3 + $0x48] sm:$0xff]   ;;  %v1634_v61 = vld [vmem:[%s2128_s3 + $0x40] sm:$0xff]  }
  0x24   : > { %1449 = vmatprep.subr.bf16.mxu1 %v1626_v26  ;;  %v1631_v57 = vld [vmem:[%s2128_s3 + $0x10] sm:$0xff]   ;;  %v292_v58 = vpack.c.bf16 %v270_v56, %v269_v55  ;;  %v1633_v60 = vld [vmem:[%s2128_s3 + $0x8] sm:$0xff]   ;;  %v271_v62 = vld [vmem:[%s1834_s9 + $0xa0] sm:$0xff] }
  0x25   : > { %416 = vmatpush1.bf16.msra.mxu0 %v1610_v10  ;;  %v272_v63 = vld [vmem:[%s1834_s9 + $0xa8] sm:$0xff]  ;;  %v1635_v0 = vld [vmem:[%s2128_s3] sm:$0xff]   ;;  %v273_v3 = vld [vmem:[%s1834_s9 + $0xb0] sm:$0xff] }
  0x26   : > { %417 = vmatprep.subr.bf16.mxu0 %v1611_v11  ;;  %v293_v1 = vpack.c.bf16 %v272_v63, %v271_v62  ;;  %v274_v4 = vld [vmem:[%s1834_s9 + $0xb8] sm:$0xff]  ;;  %v275_v6 = vld [vmem:[%s1834_s9 + $0xc0] sm:$0xff]  ;;  %v276_v7 = vld [vmem:[%s1834_s9 + $0xc8] sm:$0xff] }
  0x27   : > { %1450 = vmatpush3.bf16.msra.mxu1 %v1627_v29  ;;  %v294_v5 = vpack.c.bf16 %v274_v4, %v273_v3  ;;  %v295_v8 = vpack.c.bf16 %v276_v7, %v275_v6  ;;  %v277_v9 = vld [vmem:[%s1834_s9 + $0xd0] sm:$0xff]  ;;  %v278_v10 = vld [vmem:[%s1834_s9 + $0xd8] sm:$0xff]  ;;  %v315_v22 = vld [vmem:[%s2127_s2] sm:$0x3] }
  0x28   : > { %1451 = vmatprep.subr.bf16.mxu1 %v1628_v31  ;;  %v296_v11 = vpack.c.bf16 %v278_v10, %v277_v9  ;;  %v282_v16 = vld [vmem:[%s1834_s9 + $0xf8] sm:$0xff] }
  0x29   : > { %418 = vmatpush1.bf16.msra.mxu0 %v1613_v12  ;;  %v279_v12 = vld [vmem:[%s1834_s9 + $0xe0] sm:$0xff] }
  0x2a   : > { %419 = vmatprep.subr.bf16.mxu0 %v1614_v13  ;;  %v280_v13 = vld [vmem:[%s1834_s9 + $0xe8] sm:$0xff] }
  0x2b   : > { %1452 = vmatpush3.bf16.msra.mxu1 %v1629_v32 }
  0x2c   : > { %1453 = vmatprep.subr.bf16.mxu1 %v1630_v54 }
  0x2d   : > { %420 = vmatpush1.bf16.msra.mxu0 %v1616_v14  ;;  %v297_v14 = vpack.c.bf16 %v280_v13, %v279_v12 }
  0x2e   : > { %421 = vmatprep.subr.bf16.mxu0 %v1617_v15  ;;  %v281_v15 = vld [vmem:[%s1834_s9 + $0xf0] sm:$0xff]  ;;  %s228_s9 = sand.u32 1, %s1688_s19  }
  0x2f   : > { %1454 = vmatpush3.bf16.msra.mxu1 %v1631_v57  ;;  %v298_v17 = vpack.c.bf16 %v282_v16, %v281_v15  ;;  %s1238_s30 = sshll.u32 %s228_s9, 7  ;;  %s2065_s7 = scalar_lea.sflag [#allocation3], %s228_s9 }
  0x30   : > { %1455 = vmatprep.subr.bf16.mxu1 %v1632_v59  ;;  %s2015_s6 = scalar_lea.vmem [#allocation2], %s1238_s30 }
  0x31   : > { %422 = vmatpush1.bf16.msra.mxu0 %v1619_v19  ;;  %v318_v19 = vshrl.u32 %v317_v18, 7 }
  0x33   : > { %1456 = vmatpush3.bf16.msra.mxu1 %v1633_v60  ;;  %v323_v20 = vsub.s32 1, %v318_v19  ;;  %v319_v21 = vsub.s32 0, %v318_v19 }
  0x34   : > { %440 = vmatmul.mubr.bf16.vlgmr.msra.gmra.mxu0 %v283_v23  ;;  %1457 = vmatprep.subr.bf16.mxu1 %v1634_v61 }
  0x35   : > { %449 = vmatprep.mubr.bf16.mxu0 %v1698_v2  ;;  %v1937_v24 = vrot.slane %v315_v22, %v323_v20  ;;  %v1939_v25 = vrot.slane %v315_v22, %v319_v21 }
  0x37   : > { %1458 = vmatpush3.bf16.msra.mxu1 %v1635_v0 }
  0x3c   : > { %450 = vmatmul.mubr.bf16.gmra.mxu0 %v284_v30 }
  0x3d   : > { %459 = vmatprep.mubr.bf16.mxu0 %v1698_v2 }
  0x44   : > { %460 = vmatmul.mubr.bf16.gmra.mxu0 %v285_v35 }
  0x45   : > { %469 = vmatprep.mubr.bf16.mxu0 %v1698_v2 }
  0x4c   : > { %470 = vmatmul.mubr.bf16.gmra.mxu0 %v286_v38 }
  0x4d   : > { %479 = vmatprep.mubr.bf16.mxu0 %v1698_v2 }
  0x54   : > { %480 = vmatmul.mubr.bf16.gmra.mxu0 %v287_v41 }
  0x55   : > { %489 = vmatprep.mubr.bf16.mxu0 %v1698_v2 }
  0x5c   : > { %490 = vmatmul.mubr.bf16.gmra.mxu0 %v288_v44 }
  0x5d   : > { %499 = vmatprep.mubr.bf16.mxu0 %v1698_v2 }
  0x64   : > { %500 = vmatmul.mubr.bf16.gmra.mxu0 %v289_v47 }
  0x65   : > { %509 = vmatprep.mubr.bf16.mxu0 %v1698_v2 }
  0x6c   : > { %510 = vmatmul.mubr.bf16.gmra.mxu0 %v290_v50 }
  0x6d   : > { %519 = vmatprep.mubr.bf16.mxu0 %v1698_v2 }
  0x74   : > { %520 = vmatmul.mubr.bf16.gmra.mxu0 %v291_v53 }
  0x75   : > { %529 = vmatprep.mubr.bf16.mxu0 %v1698_v2 }
  0x7c   : > { %530 = vmatmul.mubr.bf16.gmra.mxu0 %v292_v58 }
  0x7d   : > { %539 = vmatprep.mubr.bf16.mxu0 %v1698_v2 }
  0x84   : > { %540 = vmatmul.mubr.bf16.gmra.mxu0 %v293_v1 }
  0x85   : > { %549 = vmatprep.mubr.bf16.mxu0 %v1698_v2 }
  0x8c   : > { %550 = vmatmul.mubr.bf16.gmra.mxu0 %v294_v5 }
  0x8d   : > { %559 = vmatprep.mubr.bf16.mxu0 %v1698_v2 }
  0x94   : > { %560 = vmatmul.mubr.bf16.gmra.mxu0 %v295_v8 }
  0x95   : > { %569 = vmatprep.mubr.bf16.mxu0 %v1698_v2 }
  0x9c   : > { %570 = vmatmul.mubr.bf16.gmra.mxu0 %v296_v11 }
  0x9d   : > { %579 = vmatprep.mubr.bf16.mxu0 %v1698_v2 }
  0xa4   : > { %580 = vmatmul.mubr.bf16.gmra.mxu0 %v297_v14 }
  0xa5   : > { %589 = vmatprep.mubr.bf16.mxu0 %v1698_v2 }
  0xac   : > { %590 = vmatmul.mubr.bf16.gmra.mxu0 %v298_v17 }
  0xf4   : > { %v441_v23 = vpop.f32.mrf.mxu0 }
  0xf5   : > { %v442_v29 = vadd.f32 %v441_v23, %v1939_v25 }
  0xf6   : > { %v443_v26 = vpop.f32.mrf.mxu0 }
  0xf7   : > { %v444_v2 = vadd.f32 %v443_v26, %v1937_v24  ;;  %v600_v36 = vmax.f32 %v442_v29, 0.0 }
  0xf8   : > { %v445_v27 = vpop.f32.mrf.mxu0 }
  0xf9   : > { %v446_v28 = vadd.f32 %v445_v27, %v1939_v25  ;;  %v601_v34 = vmax.f32 %v444_v2, 0.0 }
  0xfa   : > { %v447_v30 = vpop.f32.mrf.mxu0 }
  0xfb   : > { %v448_v31 = vadd.f32 %v447_v30, %v1937_v24  ;;  %v602_v32 = vmax.f32 %v446_v28, 0.0 }
  0xfc   : > { %v451_v33 = vpop.f32.mrf.mxu0 }
  0xfd   : > { %v603_v35 = vmax.f32 %v448_v31, 0.0  ;;  %v664_v39 = vpack.c.bf16 %v602_v32, %v600_v36  ;;  %v452_v43 = vadd.f32 %v451_v33, %v1939_v25 }
  0xfe   : > { %v453_v37 = vpop.f32.mrf.mxu0 }
  0xff   : > { %v665_v38 = vpack.c.bf16 %v603_v35, %v601_v34  ;;  %v454_v41 = vadd.f32 %v453_v37, %v1937_v24  ;;  %v604_v50 = vmax.f32 %v452_v43, 0.0 }
 0x100   : > { %v455_v40 = vpop.f32.mrf.mxu0 }
 0x101   : > { %v456_v42 = vadd.f32 %v455_v40, %v1939_v25  ;;  %863 = vmatprep.mubr.bf16.mxu1 %v665_v38  ;;  %v605_v48 = vmax.f32 %v454_v41, 0.0 }
 0x102   : > { %v457_v44 = vpop.f32.mrf.mxu0  ;;  %864 = vmatmul.mubr.bf16.vlgmr.msra.gmra.mxu1 %v664_v39 }
 0x103   : > { %v458_v45 = vadd.f32 %v457_v44, %v1937_v24  ;;  %v606_v46 = vmax.f32 %v456_v42, 0.0 }
 0x104   : > { %v461_v47 = vpop.f32.mrf.mxu0 }
 0x105   : > { %v607_v49 = vmax.f32 %v458_v45, 0.0  ;;  %v666_v53 = vpack.c.bf16 %v606_v46, %v604_v50  ;;  %v462_v57 = vadd.f32 %v461_v47, %v1939_v25 }
 0x106   : > { %v463_v51 = vpop.f32.mrf.mxu0 }
 0x107   : > { %v667_v52 = vpack.c.bf16 %v607_v49, %v605_v48  ;;  %v464_v55 = vadd.f32 %v463_v51, %v1937_v24  ;;  %v608_v0 = vmax.f32 %v462_v57, 0.0 }
 0x108   : > { %v465_v54 = vpop.f32.mrf.mxu0 }
 0x109   : > { %v466_v56 = vadd.f32 %v465_v54, %v1939_v25  ;;  %871 = vmatprep.mubr.bf16.mxu1 %v667_v52  ;;  %v609_v62 = vmax.f32 %v464_v55, 0.0 }
 0x10a   : > { %v467_v58 = vpop.f32.mrf.mxu0  ;;  %872 = vmatmul.mubr.bf16.gmra.mxu1 %v666_v53 }
 0x10b   : > { %v468_v59 = vadd.f32 %v467_v58, %v1937_v24  ;;  %v610_v60 = vmax.f32 %v466_v56, 0.0 }
 0x10c   : > { %v471_v61 = vpop.f32.mrf.mxu0 }
 0x10d   : > { %v611_v63 = vmax.f32 %v468_v59, 0.0  ;;  %v668_v4 = vpack.c.bf16 %v610_v60, %v608_v0  ;;  %v472_v8 = vadd.f32 %v471_v61, %v1939_v25 }
 0x10e   : > { %v473_v1 = vpop.f32.mrf.mxu0 }
 0x10f   : > { %v669_v3 = vpack.c.bf16 %v611_v63, %v609_v62  ;;  %v474_v6 = vadd.f32 %v473_v1, %v1937_v24  ;;  %v612_v15 = vmax.f32 %v472_v8, 0.0 }
 0x110   : > { %v475_v5 = vpop.f32.mrf.mxu0 }
 0x111   : > { %v476_v7 = vadd.f32 %v475_v5, %v1939_v25  ;;  %879 = vmatprep.mubr.bf16.mxu1 %v669_v3  ;;  %v613_v13 = vmax.f32 %v474_v6, 0.0 }
 0x112   : > { %v477_v9 = vpop.f32.mrf.mxu0  ;;  %880 = vmatmul.mubr.bf16.gmra.mxu1 %v668_v4 }
 0x113   : > { %v478_v10 = vadd.f32 %v477_v9, %v1937_v24  ;;  %v614_v11 = vmax.f32 %v476_v7, 0.0 }
 0x114   : > { %v481_v12 = vpop.f32.mrf.mxu0 }
 0x115   : > { %v615_v14 = vmax.f32 %v478_v10, 0.0  ;;  %v670_v18 = vpack.c.bf16 %v614_v11, %v612_v15  ;;  %v482_v22 = vadd.f32 %v481_v12, %v1939_v25 }
 0x116   : > { %v483_v16 = vpop.f32.mrf.mxu0 }
 0x117   : > { %v671_v17 = vpack.c.bf16 %v615_v14, %v613_v13  ;;  %v484_v20 = vadd.f32 %v483_v16, %v1937_v24  ;;  %v616_v30 = vmax.f32 %v482_v22, 0.0 }
 0x118   : > { %v485_v19 = vpop.f32.mrf.mxu0 }
 0x119   : > { %v486_v21 = vadd.f32 %v485_v19, %v1939_v25  ;;  %887 = vmatprep.mubr.bf16.mxu1 %v671_v17  ;;  %v617_v28 = vmax.f32 %v484_v20, 0.0 }
 0x11a   : > { %v487_v23 = vpop.f32.mrf.mxu0  ;;  %888 = vmatmul.mubr.bf16.gmra.mxu1 %v670_v18 }
 0x11b   : > { %v488_v26 = vadd.f32 %v487_v23, %v1937_v24  ;;  %v618_v27 = vmax.f32 %v486_v21, 0.0 }
 0x11c   : > { %v491_v2 = vpop.f32.mrf.mxu0 }
 0x11d   : > { %v619_v29 = vmax.f32 %v488_v26, 0.0  ;;  %v672_v33 = vpack.c.bf16 %v618_v27, %v616_v30  ;;  %v492_v37 = vadd.f32 %v491_v2, %v1939_v25 }
 0x11e   : > { %v493_v31 = vpop.f32.mrf.mxu0 }
 0x11f   : > { %v673_v32 = vpack.c.bf16 %v619_v29, %v617_v28  ;;  %v494_v35 = vadd.f32 %v493_v31, %v1937_v24  ;;  %v620_v44 = vmax.f32 %v492_v37, 0.0 }
 0x120   : > { %v495_v34 = vpop.f32.mrf.mxu0 }
 0x121   : > { %v496_v36 = vadd.f32 %v495_v34, %v1939_v25  ;;  %895 = vmatprep.mubr.bf16.mxu1 %v673_v32  ;;  %v621_v42 = vmax.f32 %v494_v35, 0.0 }
 0x122   : > { %v497_v38 = vpop.f32.mrf.mxu0  ;;  %896 = vmatmul.mubr.bf16.gmra.mxu1 %v672_v33 }
 0x123   : > { %v498_v39 = vadd.f32 %v497_v38, %v1937_v24  ;;  %v622_v40 = vmax.f32 %v496_v36, 0.0 }
 0x124   : > { %v501_v41 = vpop.f32.mrf.mxu0 }
 0x125   : > { %v623_v43 = vmax.f32 %v498_v39, 0.0  ;;  %v674_v47 = vpack.c.bf16 %v622_v40, %v620_v44  ;;  %v502_v51 = vadd.f32 %v501_v41, %v1939_v25 }
 0x126   : > { %v503_v45 = vpop.f32.mrf.mxu0 }
 0x127   : > { %v675_v46 = vpack.c.bf16 %v623_v43, %v621_v42  ;;  %v504_v49 = vadd.f32 %v503_v45, %v1937_v24  ;;  %v624_v58 = vmax.f32 %v502_v51, 0.0 }
 0x128   : > { %v505_v48 = vpop.f32.mrf.mxu0 }
 0x129   : > { %v506_v50 = vadd.f32 %v505_v48, %v1939_v25  ;;  %903 = vmatprep.mubr.bf16.mxu1 %v675_v46  ;;  %v625_v56 = vmax.f32 %v504_v49, 0.0 }
 0x12a   : > { %v507_v52 = vpop.f32.mrf.mxu0  ;;  %904 = vmatmul.mubr.bf16.gmra.mxu1 %v674_v47 }
 0x12b   : > { %v508_v53 = vadd.f32 %v507_v52, %v1937_v24  ;;  %v626_v54 = vmax.f32 %v506_v50, 0.0 }
 0x12c   : > { %v511_v55 = vpop.f32.mrf.mxu0 }
 0x12d   : > { %v627_v57 = vmax.f32 %v508_v53, 0.0  ;;  %v676_v61 = vpack.c.bf16 %v626_v54, %v624_v58  ;;  %v512_v1 = vadd.f32 %v511_v55, %v1939_v25 }
 0x12e   : > { %v513_v59 = vpop.f32.mrf.mxu0 }
 0x12f   : > { %v677_v60 = vpack.c.bf16 %v627_v57, %v625_v56  ;;  %v514_v63 = vadd.f32 %v513_v59, %v1937_v24  ;;  %v628_v9 = vmax.f32 %v512_v1, 0.0 }
 0x130   : > { %v515_v62 = vpop.f32.mrf.mxu0 }
 0x131   : > { %v516_v0 = vadd.f32 %v515_v62, %v1939_v25  ;;  %911 = vmatprep.mubr.bf16.mxu1 %v677_v60  ;;  %v629_v7 = vmax.f32 %v514_v63, 0.0 }
 0x132   : > { %v517_v3 = vpop.f32.mrf.mxu0  ;;  %912 = vmatmul.mubr.bf16.gmra.mxu1 %v676_v61 }
 0x133   : > { %v518_v4 = vadd.f32 %v517_v3, %v1937_v24  ;;  %v630_v5 = vmax.f32 %v516_v0, 0.0 }
 0x134   : > { %v521_v6 = vpop.f32.mrf.mxu0 }
 0x135   : > { %v631_v8 = vmax.f32 %v518_v4, 0.0  ;;  %v678_v12 = vpack.c.bf16 %v630_v5, %v628_v9  ;;  %v522_v16 = vadd.f32 %v521_v6, %v1939_v25 }
 0x136   : > { %v523_v10 = vpop.f32.mrf.mxu0 }
 0x137   : > { %v679_v11 = vpack.c.bf16 %v631_v8, %v629_v7  ;;  %v524_v14 = vadd.f32 %v523_v10, %v1937_v24  ;;  %v632_v23 = vmax.f32 %v522_v16, 0.0 }
 0x138   : > { %v525_v13 = vpop.f32.mrf.mxu0 }
 0x139   : > { %v526_v15 = vadd.f32 %v525_v13, %v1939_v25  ;;  %919 = vmatprep.mubr.bf16.mxu1 %v679_v11  ;;  %v633_v21 = vmax.f32 %v524_v14, 0.0 }
 0x13a   : > { %v527_v17 = vpop.f32.mrf.mxu0  ;;  %920 = vmatmul.mubr.bf16.gmra.mxu1 %v678_v12 }
 0x13b   : > { %v528_v18 = vadd.f32 %v527_v17, %v1937_v24  ;;  %v634_v19 = vmax.f32 %v526_v15, 0.0 }
 0x13c   : > { %v531_v20 = vpop.f32.mrf.mxu0 }
 0x13d   : > { %v635_v22 = vmax.f32 %v528_v18, 0.0  ;;  %v680_v2 = vpack.c.bf16 %v634_v19, %v632_v23  ;;  %v532_v31 = vadd.f32 %v531_v20, %v1939_v25 }
 0x13e   : > { %v533_v26 = vpop.f32.mrf.mxu0 }
 0x13f   : > { %v681_v27 = vpack.c.bf16 %v635_v22, %v633_v21  ;;  %v534_v29 = vadd.f32 %v533_v26, %v1937_v24  ;;  %v636_v38 = vmax.f32 %v532_v31, 0.0 }
 0x140   : > { %v535_v28 = vpop.f32.mrf.mxu0 }
 0x141   : > { %v536_v30 = vadd.f32 %v535_v28, %v1939_v25  ;;  %927 = vmatprep.mubr.bf16.mxu1 %v681_v27  ;;  %v637_v36 = vmax.f32 %v534_v29, 0.0 }
 0x142   : > { %v537_v32 = vpop.f32.mrf.mxu0  ;;  %928 = vmatmul.mubr.bf16.gmra.mxu1 %v680_v2 }
 0x143   : > { %v538_v33 = vadd.f32 %v537_v32, %v1937_v24  ;;  %v638_v34 = vmax.f32 %v536_v30, 0.0 }
 0x144   : > { %v541_v35 = vpop.f32.mrf.mxu0 }
 0x145   : > { %v639_v37 = vmax.f32 %v538_v33, 0.0  ;;  %v682_v41 = vpack.c.bf16 %v638_v34, %v636_v38  ;;  %v542_v45 = vadd.f32 %v541_v35, %v1939_v25 }
 0x146   : > { %v543_v39 = vpop.f32.mrf.mxu0 }
 0x147   : > { %v683_v40 = vpack.c.bf16 %v639_v37, %v637_v36  ;;  %v544_v43 = vadd.f32 %v543_v39, %v1937_v24  ;;  %v640_v52 = vmax.f32 %v542_v45, 0.0 }
 0x148   : > { %v545_v42 = vpop.f32.mrf.mxu0 }
 0x149   : > { %v546_v44 = vadd.f32 %v545_v42, %v1939_v25  ;;  %935 = vmatprep.mubr.bf16.mxu1 %v683_v40  ;;  %v641_v50 = vmax.f32 %v544_v43, 0.0 }
 0x14a   : > { %v547_v46 = vpop.f32.mrf.mxu0  ;;  %936 = vmatmul.mubr.bf16.gmra.mxu1 %v682_v41 }
 0x14b   : > { %v548_v47 = vadd.f32 %v547_v46, %v1937_v24  ;;  %v642_v48 = vmax.f32 %v546_v44, 0.0 }
 0x14c   : > { %v551_v49 = vpop.f32.mrf.mxu0 }
 0x14d   : > { %v643_v51 = vmax.f32 %v548_v47, 0.0  ;;  %v684_v55 = vpack.c.bf16 %v642_v48, %v640_v52  ;;  %v552_v59 = vadd.f32 %v551_v49, %v1939_v25 }
 0x14e   : > { %v553_v53 = vpop.f32.mrf.mxu0 }
 0x14f   : > { %v685_v54 = vpack.c.bf16 %v643_v51, %v641_v50  ;;  %v554_v57 = vadd.f32 %v553_v53, %v1937_v24  ;;  %v644_v3 = vmax.f32 %v552_v59, 0.0 }
 0x150   : > { %v555_v56 = vpop.f32.mrf.mxu0 }
 0x151   : > { %v556_v58 = vadd.f32 %v555_v56, %v1939_v25  ;;  %943 = vmatprep.mubr.bf16.mxu1 %v685_v54  ;;  %v645_v0 = vmax.f32 %v554_v57, 0.0 }
 0x152   : > { %v557_v60 = vpop.f32.mrf.mxu0  ;;  %944 = vmatmul.mubr.bf16.gmra.mxu1 %v684_v55 }
 0x153   : > { %v558_v61 = vadd.f32 %v557_v60, %v1937_v24  ;;  %v646_v62 = vmax.f32 %v556_v58, 0.0 }
 0x154   : > { %v561_v63 = vpop.f32.mrf.mxu0 }
 0x155   : > { %v647_v1 = vmax.f32 %v558_v61, 0.0  ;;  %v686_v6 = vpack.c.bf16 %v646_v62, %v644_v3  ;;  %v562_v10 = vadd.f32 %v561_v63, %v1939_v25 }
 0x156   : > { %v563_v4 = vpop.f32.mrf.mxu0 }
 0x157   : > { %v687_v5 = vpack.c.bf16 %v647_v1, %v645_v0  ;;  %v564_v8 = vadd.f32 %v563_v4, %v1937_v24  ;;  %v648_v17 = vmax.f32 %v562_v10, 0.0 }
 0x158   : > { %v565_v7 = vpop.f32.mrf.mxu0 }
 0x159   : > { %v566_v9 = vadd.f32 %v565_v7, %v1939_v25  ;;  %951 = vmatprep.mubr.bf16.mxu1 %v687_v5  ;;  %v649_v15 = vmax.f32 %v564_v8, 0.0 }
 0x15a   : > { %v567_v11 = vpop.f32.mrf.mxu0  ;;  %952 = vmatmul.mubr.bf16.gmra.mxu1 %v686_v6 }
 0x15b   : > { %v568_v12 = vadd.f32 %v567_v11, %v1937_v24  ;;  %v650_v13 = vmax.f32 %v566_v9, 0.0 }
 0x15c   : > { %v571_v14 = vpop.f32.mrf.mxu0 }
 0x15d   : > { %v651_v16 = vmax.f32 %v568_v12, 0.0  ;;  %v688_v20 = vpack.c.bf16 %v650_v13, %v648_v17  ;;  %v572_v26 = vadd.f32 %v571_v14, %v1939_v25 }
 0x15e   : > { %v573_v18 = vpop.f32.mrf.mxu0 }
 0x15f   : > { %v689_v19 = vpack.c.bf16 %v651_v16, %v649_v15  ;;  %v574_v22 = vadd.f32 %v573_v18, %v1937_v24  ;;  %v652_v32 = vmax.f32 %v572_v26, 0.0 }
 0x160   : > { %v575_v21 = vpop.f32.mrf.mxu0 }
 0x161   : > { %v576_v23 = vadd.f32 %v575_v21, %v1939_v25  ;;  %959 = vmatprep.mubr.bf16.mxu1 %v689_v19  ;;  %v653_v30 = vmax.f32 %v574_v22, 0.0 }
 0x162   : > { %v577_v27 = vpop.f32.mrf.mxu0  ;;  %960 = vmatmul.mubr.bf16.gmra.mxu1 %v688_v20 }
 0x163   : > { %v578_v2 = vadd.f32 %v577_v27, %v1937_v24  ;;  %v654_v28 = vmax.f32 %v576_v23, 0.0 }
 0x164   : > { %v581_v29 = vpop.f32.mrf.mxu0 }
 0x165   : > { %v655_v31 = vmax.f32 %v578_v2, 0.0  ;;  %v690_v35 = vpack.c.bf16 %v654_v28, %v652_v32  ;;  %v582_v39 = vadd.f32 %v581_v29, %v1939_v25 }
 0x166   : > { %v583_v33 = vpop.f32.mrf.mxu0 }
 0x167   : > { %v691_v34 = vpack.c.bf16 %v655_v31, %v653_v30  ;;  %v584_v37 = vadd.f32 %v583_v33, %v1937_v24  ;;  %v656_v46 = vmax.f32 %v582_v39, 0.0 }
 0x168   : > { %v585_v36 = vpop.f32.mrf.mxu0 }
 0x169   : > { %v586_v38 = vadd.f32 %v585_v36, %v1939_v25  ;;  %967 = vmatprep.mubr.bf16.mxu1 %v691_v34  ;;  %v657_v44 = vmax.f32 %v584_v37, 0.0 }
 0x16a   : > { %v587_v40 = vpop.f32.mrf.mxu0  ;;  %968 = vmatmul.mubr.bf16.gmra.mxu1 %v690_v35 }
 0x16b   : > { %v588_v41 = vadd.f32 %v587_v40, %v1937_v24  ;;  %v658_v42 = vmax.f32 %v586_v38, 0.0 }
 0x16c   : > { %v591_v43 = vpop.f32.mrf.mxu0 }
 0x16d   : > { %v659_v45 = vmax.f32 %v588_v41, 0.0  ;;  %v692_v49 = vpack.c.bf16 %v658_v42, %v656_v46  ;;  %v592_v53 = vadd.f32 %v591_v43, %v1939_v25 }
 0x16e   : > { %v593_v47 = vpop.f32.mrf.mxu0 }
 0x16f   : > { %v693_v48 = vpack.c.bf16 %v659_v45, %v657_v44  ;;  %v594_v51 = vadd.f32 %v593_v47, %v1937_v24  ;;  %v660_v59 = vmax.f32 %v592_v53, 0.0 }
 0x170   : > { %v595_v50 = vpop.f32.mrf.mxu0 }
 0x171   : > { %v596_v52 = vadd.f32 %v595_v50, %v1939_v25  ;;  %975 = vmatprep.mubr.bf16.mxu1 %v693_v48  ;;  %v661_v57 = vmax.f32 %v594_v51, 0.0  ;;  %v2009_v25 = vld [vmem:[%s2129_s4] ss:$0 sm:$0xff] }
 0x172   : > { %v597_v54 = vpop.f32.mrf.mxu0  ;;  %976 = vmatmul.mubr.bf16.gmra.mxu1 %v692_v49 }
 0x173   : > { %v598_v55 = vadd.f32 %v597_v54, %v1937_v24  ;;  %v662_v56 = vmax.f32 %v596_v52, 0.0 }
 0x175   : > { %v663_v58 = vmax.f32 %v598_v55, 0.0  ;;  %v694_v61 = vpack.c.bf16 %v662_v56, %v660_v59 }
 0x177   : > { %v695_v60 = vpack.c.bf16 %v663_v58, %v661_v57 }
 0x179   : > { %983 = vmatprep.mubr.bf16.mxu1 %v695_v60 }
 0x17a   : > { %984 = vmatmul.mubr.bf16.gmra.mxu1 %v694_v61 }
 0x1c2   : > { %v1459_v62 = vpop.f32.mrf.mxu1 }
 0x1c4   : > { %v1460_v63 = vpop.f32.mrf.mxu1 }
 0x1c5   : > { %v1461_v1 = vadd.f32 %v1460_v63, %v1459_v62 }
 0x1c6   : > { %v1462_v0 = vpop.f32.mrf.mxu1 }
 0x1c7   : > { %v866_v5 = vadd.f32 %v1461_v1, %v2009_v25 }
 0x1c8   : > { %v1463_v3 = vpop.f32.mrf.mxu1 }
 0x1c9   : > { %v1464_v24 = vadd.f32 %v1463_v3, %v1462_v0 }
 0x1ca   : > { %v1465_v4 = vpop.f32.mrf.mxu1 }
 0x1cb   : > { %v869_v6 = vadd.f32 %v1464_v24, %v2009_v25 }
 0x1cc   : > { %v1466_v7 = vpop.f32.mrf.mxu1 }
 0x1cd   : > { %v1351_v8 = vpack.c.bf16 %v869_v6, %v866_v5  ;;  %v1467_v10 = vadd.f32 %v1466_v7, %v1465_v4 }
 0x1ce   : > { %v1468_v9 = vpop.f32.mrf.mxu1 }
 0x1cf   : > { %1352 = vst [vmem:[%s2015_s6] sm:$0xff] %v1351_v8   ;;  %v874_v14 = vadd.f32 %v1467_v10, %v2009_v25 }
 0x1d0   : > { %v1469_v11 = vpop.f32.mrf.mxu1 }
 0x1d1   : > { %v1470_v12 = vadd.f32 %v1469_v11, %v1468_v9 }
 0x1d2   : > { %v1471_v13 = vpop.f32.mrf.mxu1 }
 0x1d3   : > { %v877_v15 = vadd.f32 %v1470_v12, %v2009_v25 }
 0x1d4   : > { %v1472_v16 = vpop.f32.mrf.mxu1 }
 0x1d5   : > { %v1356_v17 = vpack.c.bf16 %v877_v15, %v874_v14  ;;  %v1473_v19 = vadd.f32 %v1472_v16, %v1471_v13 }
 0x1d6   : > { %v1474_v18 = vpop.f32.mrf.mxu1 }
 0x1d7   : > { %1428 = vst [vmem:[%s2015_s6 + $0x8] sm:$0xff] %v1356_v17   ;;  %v882_v23 = vadd.f32 %v1473_v19, %v2009_v25 }
 0x1d8   : > { %v1475_v20 = vpop.f32.mrf.mxu1 }
 0x1d9   : > { %v1476_v21 = vadd.f32 %v1475_v20, %v1474_v18 }
 0x1da   : > { %v1477_v22 = vpop.f32.mrf.mxu1 }
 0x1db   : > { %v885_v26 = vadd.f32 %v1476_v21, %v2009_v25 }
 0x1dc   : > { %v1478_v27 = vpop.f32.mrf.mxu1 }
 0x1dd   : > { %v1361_v2 = vpack.c.bf16 %v885_v26, %v882_v23  ;;  %v1479_v29 = vadd.f32 %v1478_v27, %v1477_v22 }
 0x1de   : > { %v1480_v28 = vpop.f32.mrf.mxu1 }
 0x1df   : > { %1429 = vst [vmem:[%s2015_s6 + $0x10] sm:$0xff] %v1361_v2   ;;  %v890_v33 = vadd.f32 %v1479_v29, %v2009_v25 }
 0x1e0   : > { %v1481_v30 = vpop.f32.mrf.mxu1 }
 0x1e1   : > { %v1482_v31 = vadd.f32 %v1481_v30, %v1480_v28 }
 0x1e2   : > { %v1483_v32 = vpop.f32.mrf.mxu1 }
 0x1e3   : > { %v893_v34 = vadd.f32 %v1482_v31, %v2009_v25 }
 0x1e4   : > { %v1484_v35 = vpop.f32.mrf.mxu1 }
 0x1e5   : > { %v1366_v36 = vpack.c.bf16 %v893_v34, %v890_v33  ;;  %v1485_v38 = vadd.f32 %v1484_v35, %v1483_v32 }
 0x1e6   : > { %v1486_v37 = vpop.f32.mrf.mxu1 }
 0x1e7   : > { %1430 = vst [vmem:[%s2015_s6 + $0x18] sm:$0xff] %v1366_v36   ;;  %v898_v42 = vadd.f32 %v1485_v38, %v2009_v25 }
 0x1e8   : > { %v1487_v39 = vpop.f32.mrf.mxu1 }
 0x1e9   : > { %v1488_v40 = vadd.f32 %v1487_v39, %v1486_v37 }
 0x1ea   : > { %v1489_v41 = vpop.f32.mrf.mxu1 }
 0x1eb   : > { %v901_v43 = vadd.f32 %v1488_v40, %v2009_v25 }
 0x1ec   : > { %v1490_v44 = vpop.f32.mrf.mxu1 }
 0x1ed   : > { %v1371_v45 = vpack.c.bf16 %v901_v43, %v898_v42  ;;  %v1491_v47 = vadd.f32 %v1490_v44, %v1489_v41 }
 0x1ee   : > { %v1492_v46 = vpop.f32.mrf.mxu1 }
 0x1ef   : > { %1431 = vst [vmem:[%s2015_s6 + $0x20] sm:$0xff] %v1371_v45   ;;  %v906_v51 = vadd.f32 %v1491_v47, %v2009_v25 }
 0x1f0   : > { %v1493_v48 = vpop.f32.mrf.mxu1 }
 0x1f1   : > { %v1494_v49 = vadd.f32 %v1493_v48, %v1492_v46 }
 0x1f2   : > { %v1495_v50 = vpop.f32.mrf.mxu1 }
 0x1f3   : > { %v909_v52 = vadd.f32 %v1494_v49, %v2009_v25 }
 0x1f4   : > { %v1496_v53 = vpop.f32.mrf.mxu1 }
 0x1f5   : > { %v1376_v54 = vpack.c.bf16 %v909_v52, %v906_v51  ;;  %v1497_v56 = vadd.f32 %v1496_v53, %v1495_v50 }
 0x1f6   : > { %v1498_v55 = vpop.f32.mrf.mxu1 }
 0x1f7   : > { %1432 = vst [vmem:[%s2015_s6 + $0x28] sm:$0xff] %v1376_v54   ;;  %v914_v60 = vadd.f32 %v1497_v56, %v2009_v25 }
 0x1f8   : > { %v1499_v57 = vpop.f32.mrf.mxu1 }
 0x1f9   : > { %v1500_v58 = vadd.f32 %v1499_v57, %v1498_v55 }
 0x1fa   : > { %v1501_v59 = vpop.f32.mrf.mxu1 }
 0x1fb   : > { %v917_v61 = vadd.f32 %v1500_v58, %v2009_v25 }
 0x1fc   : > { %v1502_v62 = vpop.f32.mrf.mxu1 }
 0x1fd   : > { %v1381_v63 = vpack.c.bf16 %v917_v61, %v914_v60  ;;  %v1503_v1 = vadd.f32 %v1502_v62, %v1501_v59 }
 0x1fe   : > { %v1504_v0 = vpop.f32.mrf.mxu1 }
 0x1ff   : > { %1433 = vst [vmem:[%s2015_s6 + $0x30] sm:$0xff] %v1381_v63   ;;  %v922_v5 = vadd.f32 %v1503_v1, %v2009_v25 }
 0x200   : > { %v1505_v3 = vpop.f32.mrf.mxu1 }
 0x201   : > { %v1506_v24 = vadd.f32 %v1505_v3, %v1504_v0 }
 0x202   : > { %v1507_v4 = vpop.f32.mrf.mxu1 }
 0x203   : > { %v925_v6 = vadd.f32 %v1506_v24, %v2009_v25 }
 0x204   : > { %v1508_v7 = vpop.f32.mrf.mxu1 }
 0x205   : > { %v1386_v8 = vpack.c.bf16 %v925_v6, %v922_v5  ;;  %v1509_v10 = vadd.f32 %v1508_v7, %v1507_v4 }
 0x206   : > { %v1510_v9 = vpop.f32.mrf.mxu1 }
 0x207   : > { %1434 = vst [vmem:[%s2015_s6 + $0x38] sm:$0xff] %v1386_v8   ;;  %v930_v14 = vadd.f32 %v1509_v10, %v2009_v25 }
 0x208   : > { %v1511_v11 = vpop.f32.mrf.mxu1 }
 0x209   : > { %v1512_v12 = vadd.f32 %v1511_v11, %v1510_v9 }
 0x20a   : > { %v1513_v13 = vpop.f32.mrf.mxu1 }
 0x20b   : > { %v933_v15 = vadd.f32 %v1512_v12, %v2009_v25 }
 0x20c   : > { %v1514_v16 = vpop.f32.mrf.mxu1 }
 0x20d   : > { %v1391_v17 = vpack.c.bf16 %v933_v15, %v930_v14  ;;  %v1515_v19 = vadd.f32 %v1514_v16, %v1513_v13 }
 0x20e   : > { %v1516_v18 = vpop.f32.mrf.mxu1 }
 0x20f   : > { %1435 = vst [vmem:[%s2015_s6 + $0x40] sm:$0xff] %v1391_v17   ;;  %v938_v23 = vadd.f32 %v1515_v19, %v2009_v25 }
 0x210   : > { %v1517_v20 = vpop.f32.mrf.mxu1 }
 0x211   : > { %v1518_v21 = vadd.f32 %v1517_v20, %v1516_v18 }
 0x212   : > { %v1519_v22 = vpop.f32.mrf.mxu1 }
 0x213   : > { %v941_v26 = vadd.f32 %v1518_v21, %v2009_v25 }
 0x214   : > { %v1520_v27 = vpop.f32.mrf.mxu1 }
 0x215   : > { %v1396_v2 = vpack.c.bf16 %v941_v26, %v938_v23  ;;  %v1521_v29 = vadd.f32 %v1520_v27, %v1519_v22 }
 0x216   : > { %v1522_v28 = vpop.f32.mrf.mxu1 }
 0x217   : > { %1436 = vst [vmem:[%s2015_s6 + $0x48] sm:$0xff] %v1396_v2   ;;  %v946_v33 = vadd.f32 %v1521_v29, %v2009_v25 }
 0x218   : > { %v1523_v30 = vpop.f32.mrf.mxu1 }
 0x219   : > { %v1524_v31 = vadd.f32 %v1523_v30, %v1522_v28 }
 0x21a   : > { %v1525_v32 = vpop.f32.mrf.mxu1 }
 0x21b   : > { %v949_v34 = vadd.f32 %v1524_v31, %v2009_v25 }
 0x21c   : > { %v1526_v35 = vpop.f32.mrf.mxu1 }
 0x21d   : > { %v1401_v36 = vpack.c.bf16 %v949_v34, %v946_v33  ;;  %v1527_v38 = vadd.f32 %v1526_v35, %v1525_v32 }
 0x21e   : > { %v1528_v37 = vpop.f32.mrf.mxu1 }
 0x21f   : > { %1437 = vst [vmem:[%s2015_s6 + $0x50] sm:$0xff] %v1401_v36   ;;  %v954_v42 = vadd.f32 %v1527_v38, %v2009_v25 }
 0x220   : > { %v1529_v39 = vpop.f32.mrf.mxu1 }
 0x221   : > { %v1530_v40 = vadd.f32 %v1529_v39, %v1528_v37 }
 0x222   : > { %v1531_v41 = vpop.f32.mrf.mxu1 }
 0x223   : > { %v957_v43 = vadd.f32 %v1530_v40, %v2009_v25 }
 0x224   : > { %v1532_v44 = vpop.f32.mrf.mxu1 }
 0x225   : > { %v1406_v45 = vpack.c.bf16 %v957_v43, %v954_v42  ;;  %v1533_v47 = vadd.f32 %v1532_v44, %v1531_v41 }
 0x226   : > { %v1534_v46 = vpop.f32.mrf.mxu1 }
 0x227   : > { %1438 = vst [vmem:[%s2015_s6 + $0x58] sm:$0xff] %v1406_v45   ;;  %v962_v51 = vadd.f32 %v1533_v47, %v2009_v25 }
 0x228   : > { %v1535_v48 = vpop.f32.mrf.mxu1 }
 0x229   : > { %v1536_v49 = vadd.f32 %v1535_v48, %v1534_v46 }
 0x22a   : > { %v1537_v50 = vpop.f32.mrf.mxu1 }
 0x22b   : > { %v965_v52 = vadd.f32 %v1536_v49, %v2009_v25 }
 0x22c   : > { %v1538_v53 = vpop.f32.mrf.mxu1 }
 0x22d   : > { %v1411_v54 = vpack.c.bf16 %v965_v52, %v962_v51  ;;  %v1539_v56 = vadd.f32 %v1538_v53, %v1537_v50 }
 0x22e   : > { %v1540_v55 = vpop.f32.mrf.mxu1 }
 0x22f   : > { %1439 = vst [vmem:[%s2015_s6 + $0x60] sm:$0xff] %v1411_v54   ;;  %v970_v60 = vadd.f32 %v1539_v56, %v2009_v25 }
 0x230   : > { %v1541_v57 = vpop.f32.mrf.mxu1 }
 0x231   : > { %v1542_v58 = vadd.f32 %v1541_v57, %v1540_v55 }
 0x232   : > { %v1543_v59 = vpop.f32.mrf.mxu1 }
 0x233   : > { %v973_v61 = vadd.f32 %v1542_v58, %v2009_v25 }
 0x234   : > { %v1544_v62 = vpop.f32.mrf.mxu1 }
 0x235   : > { %v1416_v63 = vpack.c.bf16 %v973_v61, %v970_v60  ;;  %v1545_v1 = vadd.f32 %v1544_v62, %v1543_v59 }
 0x236   : > { %v1546_v0 = vpop.f32.mrf.mxu1 }
 0x237   : > { %1440 = vst [vmem:[%s2015_s6 + $0x68] sm:$0xff] %v1416_v63   ;;  %v978_v5 = vadd.f32 %v1545_v1, %v2009_v25 }
 0x238   : > { %v1547_v3 = vpop.f32.mrf.mxu1 }
 0x239   : > { %v1548_v24 = vadd.f32 %v1547_v3, %v1546_v0 }
 0x23a   : > { %v1549_v4 = vpop.f32.mrf.mxu1 }
 0x23b   : > { %v981_v6 = vadd.f32 %v1548_v24, %v2009_v25 }
 0x23c   : > { %v1550_v7 = vpop.f32.mrf.mxu1 }
 0x23d   : > { %v1421_v8 = vpack.c.bf16 %v981_v6, %v978_v5  ;;  %v1551_v10 = vadd.f32 %v1550_v7, %v1549_v4 }
 0x23e   : > { %v1552_v9 = vpop.f32.mrf.mxu1 }
 0x23f   : > { %1441 = vst [vmem:[%s2015_s6 + $0x70] sm:$0xff] %v1421_v8   ;;  %v986_v13 = vadd.f32 %v1551_v10, %v2009_v25 }
 0x240   : > { %v1553_v11 = vpop.f32.mrf.mxu1 }
 0x241   : > { %v1554_v12 = vadd.f32 %v1553_v11, %v1552_v9 }
 0x243   : > { %v989_v14 = vadd.f32 %v1554_v12, %v2009_v25  ;;  %1159 = sbr.rel (!%p1770_p5) target bundleno = 611 (0x263), region = 44 }
 0x245   : > { %v1426_v15 = vpack.c.bf16 %v989_v14, %v986_v13 }
 0x247   : > { %1442 = vst [vmem:[%s2015_s6 + $0x78] sm:$0xff] %v1426_v15  }
 0x248   : > { %s2138_s8 = smov (!%p1162_p11, %s1161_s8), 32 }
 0x249   : > { %s2070_s10 = sshll.u32 %s2138_s8, 6 }
 0x24a   : > { %s1166_s11 = ssub.s32 2048, %s2070_s10 }
 0x24b   : > { %1167 = vsyncadd %s2065_s7, %s1166_s11  ;;  %p1309_p12 = scmp.ne.s32.totalorder %s2070_s10, 0  ;;  %s1347_s12 = sshll.u32 %s1753_s22, 11 }
 0x24c   : > { %s2079_s14 = scalar_lea.hbm %s2130_s5, %s1347_s12  ;;  %s1172_s25 = sshll.u32 %s2015_s6, 4  ;;  %s2082_s25 = int_to_ptr.vmem [resolvable:$true] %s1172_s25 }
 0x24d   : > { %s1636_s15 = scalar_lea.vmem %s2082_s25, %s2070_s10  ;;  %s1699_s16 = smov [#allocation2]  }
 0x24e   : > { %p1637_p13 = scmp.ne.s32.totalorder %s2082_s25, %s1636_s15  ;;  %s1640_s23 = sshll.u32 %s1699_s16, 4  ;;  %s1641_s23 = int_to_ptr.vmem [resolvable:$false] %s1640_s23 }
 0x24f   : > { %s1642_s22 = scalar_lea.vmem %s1641_s23, 4096  ;;  %p1643_p2 = scmp.lt.s32.totalorder %s2082_s25, %s1641_s23 }
 0x250   : > { %p1638_p0 = pnand %p1637_p13, %p1309_p12  ;;  %p1644_p3 = scmp.lt.s32.totalorder %s1642_s22, %s1636_s15 }
 0x252   : > { %p1639_p1 = pneg %p1638_p0  ;;  %p1645_p4 = por %p1644_p3, %p1643_p2 }
 0x254   : > { %p1646_p5 = pnand %p1645_p4, %p1639_p1 }
 0x256   : > { %1649 = shalt.err (!%p1646_p5)
}
 0x257   : > { %s1650_s9 = scalar_lea.hbm %s2079_s14, %s2070_s10  ;;  %s1654_s30 = scalar_lea.hbm %s2130_s5, 2432 }
 0x258   : > { %p1651_p7 = scmp.ne.s32.totalorder %s2079_s14, %s1650_s9  ;;  %p1655_p10 = scmp.lt.s32.totalorder %s2079_s14, %s2130_s5 }
 0x259   : > { %p1656_p11 = scmp.lt.s32.totalorder %s1654_s30, %s1650_s9 }
 0x25a   : > { %p1652_p8 = pnand %p1651_p7, %p1309_p12 }
 0x25b   : > { %p1657_p13 = por %p1656_p11, %p1655_p10 }
 0x25c   : > { %p1653_p9 = pneg %p1652_p8 }
 0x25e   : > { %p1658_p0 = pnand %p1657_p13, %p1653_p9 }
 0x260   : > { %1661 = shalt.err (!%p1658_p0)
}
 0x261   : > { %s1700_s11 = smov 64   ;;  %s1701_s12 = smov 4  }
 0x262   : > { %1178 = dma.vmem_to_hbm [thread:$0]  (%p1309_p12), %s2082_s25, %s2070_s10, %s2079_s14, %s2065_s7, %s1700_s11, %s1700_s11, %s1701_s12  }
 0x263 PF: > { %p1560_p1 = scmp.ge.s32.totalorder %s1696_s21, 2  ;;  %s1187_s13 = sand.u32 1, %s1684_s18  }
 0x264   : > { %s1188_s28 = scalar_lea.sflag [#allocation3], %s1187_s13 }
 0x265   : > { %p1557_p2 = pnand %p1560_p1, %p1774_p6 }
 0x267   : > { %p1558_p3 = pneg %p1557_p2 }
 0x269   : > { %1679 = dma.done.wait (%p1558_p3), %s1188_s28, 2048  }
 0x26a   : > { %1681 = vsyncadd (%p1558_p3), %s1188_s28, 4294965248  ;;  %p15_p4 = scmp.ge.s32.totalorder %s1757_s24, 4   ;;  %s2133_s18 = smov %s1688_s19 }
 0x26b   : > { %s2134_s19 = smov %s1692_s20  ;;  %s2135_s20 = smov %s1768_s27 }
 0x26c   : > { %s2136_s21 = smov %s1757_s24  ;;  %17 = sbr.rel (!%p15_p4) target bundleno = 3 (0x3), region = 75 }
 0x271   :  { %1193 = vsyncpa [#allocation3], 1 }
 0x272   :  { %1195 = vsyncpa [#allocation3 + $0x1], 1 }

</bundles_post_ra>
